<compile_context>
chip_gen: v6e
topology: v6e:2x2x1
jax: 0.10.0
libtpu: 0.0.40
codegen_flags: <defaults>
</compile_context>

<pallas_src>
import jax
import jax.numpy as jnp
from jax.experimental import pallas as pl
from jax.experimental.pallas import tpu as pltpu


def _round_up(x, m):
    return (x + m - 1) // m * m


def critic_kernel(s_ref, a_ref, w1s_ref, w1a_ref, b1_ref,
                  w2_ref, b2_ref, wq_ref, bq_ref, q_ref):
    # fc1: cat([state, action]) @ W1  ==  state @ W1s + action @ W1a
    # (bf16 MXU operands, f32 accumulation; bias add / ReLU stay f32 on the VPU)
    s = s_ref[...].astype(jnp.bfloat16)
    a = a_ref[...].astype(jnp.bfloat16)
    h1 = jnp.dot(s, w1s_ref[...], preferred_element_type=jnp.float32)
    h1 = h1 + jnp.dot(a, w1a_ref[...], preferred_element_type=jnp.float32)
    h1 = jnp.maximum(h1 + b1_ref[...], 0.0)

    # fc2 + relu (K=N=256 bf16 fills the MXU cleanly on v5e/v6e/v7x)
    h2 = jnp.dot(h1.astype(jnp.bfloat16), w2_ref[...],
                 preferred_element_type=jnp.float32)
    h2 = jnp.maximum(h2 + b2_ref[...], 0.0)

    # q head (fc2 -> 1): VPU multiply + lane reduction (no wasted 1-wide MXU
    # matmul), then a cheap XLU transpose to a lane-dense (1, tm) row so the
    # output store is full-width unmasked vst instead of 1-lane vst.msk.
    q_col = jnp.sum(h2 * wq_ref[...], axis=-1, keepdims=True) + bq_ref[...]   # (tm, 1)
    q_ref[...] = jnp.transpose(q_col).astype(q_ref.dtype)                     # (1, tm)


def prepare_params(params, input_dims):
    """One-time weight preprocessing (hoisted out of the forward path).

    Splits W1 into state/action halves (so the concat never materializes),
    casts MXU weights to bf16, and reshapes the q head to a (1, fc2) row.
    """
    w1, b1, w2, b2, wq, bq = params
    fc2 = w2.shape[1]
    return dict(
        w1s=jnp.asarray(w1[:input_dims], jnp.bfloat16),
        w1a=jnp.asarray(w1[input_dims:], jnp.bfloat16),
        b1=jnp.asarray(b1, jnp.float32).reshape(1, -1),
        w2=jnp.asarray(w2, jnp.bfloat16),
        b2=jnp.asarray(b2, jnp.float32).reshape(1, -1),
        wq=jnp.asarray(wq, jnp.float32).reshape(1, fc2),
        bq=jnp.asarray(bq, jnp.float32).reshape(1, 1),
    )


def critic_forward(state, action, prep, *, block_b=1024):
    """state: (B, input_dims), action: (B, n_actions) -> q: (B, 1) float32."""
    B, in_dim = state.shape
    n_act = action.shape[1]
    w1s, w1a, b1 = prep["w1s"], prep["w1a"], prep["b1"]
    w2, b2 = prep["w2"], prep["b2"]
    wq, bq = prep["wq"], prep["bq"]

    # Batch tiling:
    #  * tiny batches (<=16): one program, everything in VMEM.
    #  * moderate batches: split into >=2 blocks (8-aligned) so the "parallel"
    #    batch axis shards across v7x's two TensorCores.
    #  * large batches: block_b-row blocks (sweepable; amortizes the ~0.35 us
    #    fixed per-grid-step overhead).
    if B <= 16:
        tm = B
    elif B <= block_b:
        tm = _round_up(pl.cdiv(B, 2), 8)
    else:
        tm = block_b
    bp = _round_up(B, tm)
    if bp != B:
        pad = bp - B
        # NOTE: padded rows produce garbage q values; the [:B] slice below is
        # required for correctness.
        state = jnp.pad(state, ((0, pad), (0, 0)))
        action = jnp.pad(action, ((0, pad), (0, 0)))
    nb = bp // tm

    def resident(arr):
        n = arr.ndim
        return pl.BlockSpec(arr.shape, lambda i, _n=n: (0,) * _n)

    # v5e's scoped-VMEM default is 16 MiB; only raise it when the tile is big.
    vmem_limit = 40 * 1024 * 1024 if tm >= 1024 else None

    q_rows = pl.pallas_call(
        critic_kernel,
        out_shape=jax.ShapeDtypeStruct((nb, tm), jnp.float32),
        grid=(nb,),
        in_specs=[
            pl.BlockSpec((tm, in_dim), lambda i: (i, 0)),   # state block
            pl.BlockSpec((tm, n_act), lambda i: (i, 0)),    # action block
            resident(w1s), resident(w1a), resident(b1),
            resident(w2), resident(b2),
            resident(wq), resident(bq),
        ],
        out_specs=pl.BlockSpec((1, tm), lambda i: (i, 0)),  # lane-dense q row
        compiler_params=pltpu.CompilerParams(
            dimension_semantics=("parallel",),
            vmem_limit_bytes=vmem_limit,
        ),
    )(state, action, w1s, w1a, b1, w2, b2, wq, bq)

    return q_rows.reshape(-1)[:B].reshape(B, 1)


def init_params(key, input_dims, n_actions, fc1_dims=256, fc2_dims=256):
    """Deterministic init mimicking torch.nn.Linear (U[-1/sqrt(fan_in), +1/sqrt(fan_in)])."""
    def linear(key, fan_in, fan_out):
        kw, kb = jax.random.split(key)
        bound = 1.0 / jnp.sqrt(fan_in)
        # stored as (fan_in, fan_out) so the math is x @ W
        w = jax.random.uniform(kw, (fan_in, fan_out), jnp.float32, -bound, bound)
        b = jax.random.uniform(kb, (1, fan_out), jnp.float32, -bound, bound)
        return w, b

    k1, k2, k3 = jax.random.split(key, 3)
    w1, b1 = linear(k1, input_dims + n_actions, fc1_dims)
    w2, b2 = linear(k2, fc1_dims, fc2_dims)
    wq, bq = linear(k3, fc2_dims, 1)
    return (w1, b1, w2, b2, wq, bq)


def reference_forward(state, action, params):
    """Exact f32 math of the PyTorch forward."""
    w1, b1, w2, b2, wq, bq = params
    x = jnp.concatenate([state, action], axis=1)
    h1 = jnp.maximum(x @ w1 + b1, 0.0)
    h2 = jnp.maximum(h1 @ w2 + b2, 0.0)
    return h2 @ wq + bq


if __name__ == "__main__":
    INPUT_DIMS, N_ACTIONS = 8, 4

    key = jax.random.PRNGKey(0)
    k_params, k_small, k_big = jax.random.split(key, 3)

    params = init_params(k_params, INPUT_DIMS, N_ACTIONS)
    prep = jax.tree_util.tree_map(jax.block_until_ready,
                                  prepare_params(params, INPUT_DIMS))

    # Small batch (single-program path) and a moderate batch (multi-block +
    # padding path) to exercise both tilings.
    for B, k in ((2, k_small), (300, k_big)):
        ks, ka = jax.random.split(k)
        state = jax.random.normal(ks, (B, INPUT_DIMS), jnp.float32)
        action = jax.random.normal(ka, (B, N_ACTIONS), jnp.float32)

        q = jax.block_until_ready(critic_forward(state, action, prep))
        q_ref = reference_forward(state, action, params)

        assert q.shape == (B, 1), q.shape
        # Kernel uses bf16 MXU operands with f32 accumulation -> bf16-scale tol.
        assert jnp.allclose(q, q_ref, atol=5e-2, rtol=5e-2), (B, q[:4], q_ref[:4])

    print("KERNEL_OK")
</pallas_src>

<mosaic_0001>
module attributes {stable_mosaic.version = 11 : i64} {
  func.func @critic_kernel(%arg0: i32, %arg1: memref<2x8xf32, #tpu.memory_space<vmem>>, %arg2: memref<2x4xf32, #tpu.memory_space<vmem>>, %arg3: memref<8x256xbf16, #tpu.memory_space<vmem>>, %arg4: memref<4x256xbf16, #tpu.memory_space<vmem>>, %arg5: memref<1x256xf32, #tpu.memory_space<vmem>>, %arg6: memref<256x256xbf16, #tpu.memory_space<vmem>>, %arg7: memref<1x256xf32, #tpu.memory_space<vmem>>, %arg8: memref<1x256xf32, #tpu.memory_space<vmem>>, %arg9: memref<1x1xf32, #tpu.memory_space<vmem>>, %arg10: memref<1x2xf32, #tpu.memory_space<vmem>>) attributes {dimension_semantics = [#tpu.dimension_semantics<parallel>], iteration_bounds = array<i64: 1>, scalar_prefetch = 0 : i64, scratch_operands = 0 : i64, tpu.core_type = #tpu.core_type<tc>, window_params = [{transform_indices = @transform_0, window_bounds = array<i64: 2, 8>}, {transform_indices = @transform_1, window_bounds = array<i64: 2, 4>}, {pipeline_mode = #tpu.pipeline_mode<synchronous>, transform_indices = @transform_2, window_bounds = array<i64: 8, 256>}, {pipeline_mode = #tpu.pipeline_mode<synchronous>, transform_indices = @transform_3, window_bounds = array<i64: 4, 256>}, {pipeline_mode = #tpu.pipeline_mode<synchronous>, transform_indices = @transform_4, window_bounds = array<i64: 1, 256>}, {pipeline_mode = #tpu.pipeline_mode<synchronous>, transform_indices = @transform_5, window_bounds = array<i64: 256, 256>}, {pipeline_mode = #tpu.pipeline_mode<synchronous>, transform_indices = @transform_6, window_bounds = array<i64: 1, 256>}, {pipeline_mode = #tpu.pipeline_mode<synchronous>, transform_indices = @transform_7, window_bounds = array<i64: 1, 256>}, {pipeline_mode = #tpu.pipeline_mode<synchronous>, transform_indices = @transform_8, window_bounds = array<i64: 1, 1>}, {transform_indices = @transform_9, window_bounds = array<i64: 1, 2>}]} {
    %c0 = arith.constant 0 : index
    %c0_0 = arith.constant 0 : index
    %0 = vector.load %arg1[%c0, %c0_0] : memref<2x8xf32, #tpu.memory_space<vmem>>, vector<2x8xf32>
    %1 = arith.truncf %0 : vector<2x8xf32> to vector<2x8xbf16>
    %c0_1 = arith.constant 0 : index
    %c0_2 = arith.constant 0 : index
    %2 = vector.load %arg2[%c0_1, %c0_2] : memref<2x4xf32, #tpu.memory_space<vmem>>, vector<2x4xf32>
    %3 = arith.truncf %2 : vector<2x4xf32> to vector<2x4xbf16>
    %c0_3 = arith.constant 0 : index
    %c0_4 = arith.constant 0 : index
    %4 = vector.load %arg3[%c0_3, %c0_4] : memref<8x256xbf16, #tpu.memory_space<vmem>>, vector<8x256xbf16>
    %cst = arith.constant dense<0.000000e+00> : vector<2x256xf32>
    %5 = tpu.matmul %1, %4, %cst {dimension_numbers = #tpu.dot_dimension_numbers<[1], [0], [0], [1], [0, 0, 1, 1], [], []>} : vector<2x8xbf16>, vector<8x256xbf16>, vector<2x256xf32> -> vector<2x256xf32>
    %c0_5 = arith.constant 0 : index
    %c0_6 = arith.constant 0 : index
    %6 = vector.load %arg4[%c0_5, %c0_6] : memref<4x256xbf16, #tpu.memory_space<vmem>>, vector<4x256xbf16>
    %cst_7 = arith.constant dense<0.000000e+00> : vector<2x256xf32>
    %7 = tpu.matmul %3, %6, %cst_7 {dimension_numbers = #tpu.dot_dimension_numbers<[1], [0], [0], [1], [0, 0, 1, 1], [], []>} : vector<2x4xbf16>, vector<4x256xbf16>, vector<2x256xf32> -> vector<2x256xf32>
    %8 = arith.addf %5, %7 : vector<2x256xf32>
    %c0_8 = arith.constant 0 : index
    %c0_9 = arith.constant 0 : index
    %9 = vector.load %arg5[%c0_8, %c0_9] : memref<1x256xf32, #tpu.memory_space<vmem>>, vector<1x256xf32>
    %10 = vector.broadcast %9 : vector<1x256xf32> to vector<2x256xf32>
    %11 = arith.addf %8, %10 : vector<2x256xf32>
    %cst_10 = arith.constant 0.000000e+00 : f32
    %12 = vector.broadcast %cst_10 : f32 to vector<2x256xf32>
    %13 = arith.maximumf %11, %12 : vector<2x256xf32>
    %14 = arith.truncf %13 : vector<2x256xf32> to vector<2x256xbf16>
    %c0_11 = arith.constant 0 : index
    %c0_12 = arith.constant 0 : index
    %15 = vector.load %arg6[%c0_11, %c0_12] : memref<256x256xbf16, #tpu.memory_space<vmem>>, vector<256x256xbf16>
    %cst_13 = arith.constant dense<0.000000e+00> : vector<2x256xf32>
    %16 = tpu.matmul %14, %15, %cst_13 {dimension_numbers = #tpu.dot_dimension_numbers<[1], [0], [0], [1], [0, 0, 1, 1], [], []>} : vector<2x256xbf16>, vector<256x256xbf16>, vector<2x256xf32> -> vector<2x256xf32>
    %c0_14 = arith.constant 0 : index
    %c0_15 = arith.constant 0 : index
    %17 = vector.load %arg7[%c0_14, %c0_15] : memref<1x256xf32, #tpu.memory_space<vmem>>, vector<1x256xf32>
    %18 = vector.broadcast %17 : vector<1x256xf32> to vector<2x256xf32>
    %19 = arith.addf %16, %18 : vector<2x256xf32>
    %cst_16 = arith.constant 0.000000e+00 : f32
    %20 = vector.broadcast %cst_16 : f32 to vector<2x256xf32>
    %21 = arith.maximumf %19, %20 : vector<2x256xf32>
    %c0_17 = arith.constant 0 : index
    %c0_18 = arith.constant 0 : index
    %22 = vector.load %arg8[%c0_17, %c0_18] : memref<1x256xf32, #tpu.memory_space<vmem>>, vector<1x256xf32>
    %23 = vector.broadcast %22 : vector<1x256xf32> to vector<2x256xf32>
    %24 = arith.mulf %21, %23 : vector<2x256xf32>
    %cst_19 = arith.constant dense<0.000000e+00> : vector<2xf32>
    %25 = vector.multi_reduction <add>, %24, %cst_19 [1] : vector<2x256xf32> to vector<2xf32>
    %26 = vector.shape_cast %25 : vector<2xf32> to vector<2x1xf32>
    %c0_20 = arith.constant 0 : index
    %c0_21 = arith.constant 0 : index
    %27 = vector.load %arg9[%c0_20, %c0_21] : memref<1x1xf32, #tpu.memory_space<vmem>>, vector<1x1xf32>
    %28 = vector.broadcast %27 : vector<1x1xf32> to vector<2x1xf32>
    %29 = arith.addf %26, %28 : vector<2x1xf32>
    %30 = tpu.transpose %29, [1, 0] : vector<2x1xf32> -> vector<1x2xf32>
    %c0_22 = arith.constant 0 : index
    %c0_23 = arith.constant 0 : index
    %31 = vector.load %arg10[%c0_22, %c0_23] : memref<1x2xf32, #tpu.memory_space<vmem>>, vector<1x2xf32>
    tpu.vector_store %arg10[%c0_22, %c0_23], %30 {strides = array<i32>} : memref<1x2xf32, #tpu.memory_space<vmem>>, vector<1x2xf32>,
    return
  }
  func.func @transform_0(%arg0: i32) -> (i32, i32) {
    %c0_i32 = arith.constant 0 : i32
    %c0_i32_0 = arith.constant 0 : i32
    return %arg0, %c0_i32 : i32, i32
  }
  func.func @transform_1(%arg0: i32) -> (i32, i32) {
    %c0_i32 = arith.constant 0 : i32
    %c0_i32_0 = arith.constant 0 : i32
    return %arg0, %c0_i32 : i32, i32
  }
  func.func @transform_2(%arg0: i32) -> (i32, i32) {
    %c0_i32 = arith.constant 0 : i32
    %c0_i32_0 = arith.constant 0 : i32
    %c0_i32_1 = arith.constant 0 : i32
    return %c0_i32, %c0_i32_0 : i32, i32
  }
  func.func @transform_3(%arg0: i32) -> (i32, i32) {
    %c0_i32 = arith.constant 0 : i32
    %c0_i32_0 = arith.constant 0 : i32
    %c0_i32_1 = arith.constant 0 : i32
    return %c0_i32, %c0_i32_0 : i32, i32
  }
  func.func @transform_4(%arg0: i32) -> (i32, i32) {
    %c0_i32 = arith.constant 0 : i32
    %c0_i32_0 = arith.constant 0 : i32
    %c0_i32_1 = arith.constant 0 : i32
    return %c0_i32, %c0_i32_0 : i32, i32
  }
  func.func @transform_5(%arg0: i32) -> (i32, i32) {
    %c0_i32 = arith.constant 0 : i32
    %c0_i32_0 = arith.constant 0 : i32
    %c0_i32_1 = arith.constant 0 : i32
    return %c0_i32, %c0_i32_0 : i32, i32
  }
  func.func @transform_6(%arg0: i32) -> (i32, i32) {
    %c0_i32 = arith.constant 0 : i32
    %c0_i32_0 = arith.constant 0 : i32
    %c0_i32_1 = arith.constant 0 : i32
    return %c0_i32, %c0_i32_0 : i32, i32
  }
  func.func @transform_7(%arg0: i32) -> (i32, i32) {
    %c0_i32 = arith.constant 0 : i32
    %c0_i32_0 = arith.constant 0 : i32
    %c0_i32_1 = arith.constant 0 : i32
    return %c0_i32, %c0_i32_0 : i32, i32
  }
  func.func @transform_8(%arg0: i32) -> (i32, i32) {
    %c0_i32 = arith.constant 0 : i32
    %c0_i32_0 = arith.constant 0 : i32
    %c0_i32_1 = arith.constant 0 : i32
    return %c0_i32, %c0_i32_0 : i32, i32
  }
  func.func @transform_9(%arg0: i32) -> (i32, i32) {
    %c0_i32 = arith.constant 0 : i32
    %c0_i32_0 = arith.constant 0 : i32
    return %arg0, %c0_i32 : i32, i32
  }
}

</mosaic_0001>

<bundles_post_ra>
// kernel: tpu_custom_call.1
= control target key start
LH: loop header
LB: loop body
LE: loop exit
PB: predicated region body
PF: predicated region fallthrough
CT: control target
= control target key end

     0   :  { %s814_s0 = inlined_call_operand.vmem [shape: f32[2,8], index: 0, kind: input, shape index: {}]   ;;  %s815_s1 = inlined_call_operand.hbm [shape: f32[2,4], index: 1, kind: input, shape index: {}]   ;;  %s816_s2 = inlined_call_operand.hbm [shape: bf16[8,256], index: 2, kind: input, shape index: {}]   ;;  %s817_s3 = inlined_call_operand.vmem [shape: bf16[4,256], index: 3, kind: input, shape index: {}]   ;;  %s818_s4 = inlined_call_operand.vmem [shape: f32[1,256], index: 4, kind: input, shape index: {}]   ;;  %s819_s5 = inlined_call_operand.hbm [shape: bf16[256,256], index: 5, kind: input, shape index: {}]   ;;  %s820_s6 = inlined_call_operand.vmem [shape: f32[1,256], index: 6, kind: input, shape index: {}]   ;;  %s821_s7 = inlined_call_operand.vmem [shape: f32[1,256], index: 7, kind: input, shape index: {}]   ;;  %s822_s8 = inlined_call_operand.<no memory space> [shape: f32[1,1], index: 8, kind: input, shape index: {}]   ;;  %s823_s9 = inlined_call_operand.hbm [shape: f32[1,2], index: 9, kind: output, shape index: {}]  }
   0x1   :  { %v14_v0 = vstv %s822_s8 }
   0x2   :  { %15 = vst [vmem:[#allocation2] sm:$0x1] %v14_v0 }
   0x3   :  { %16 = vsyncpa [#allocation4], 0 }
   0x4   :  { %17 = vsyncpa [#allocation7], 0 }
   0x5   :  { %18 = vsyncpa [#allocation5], 0  ;;  %s723_s11 = smov [#allocation6]   ;;  %s724_s13 = smov [#allocation3]  }
   0x6   :  { %s37_s12 = sshll.u32 %s723_s11, 4  ;;  %s27_s14 = sshll.u32 %s724_s13, 4  ;;  %s38_s12 = int_to_ptr.vmem [resolvable:$true] %s37_s12  ;;  %s28_s14 = int_to_ptr.vmem [resolvable:$true] %s27_s14 }
   0x7   :  { %s645_s15 = scalar_lea.vmem %s38_s12, 128  ;;  %p650_p1 = scmp.lt.s32.totalorder %s38_s12, %s38_s12 }
   0x8   :  { %p646_p0 = scmp.ne.s32.totalorder %s38_s12, %s645_s15  ;;  %p651_p2 = scmp.lt.s32.totalorder %s645_s15, %s645_s15 }
   0xa   :  { %p652_p3 = por %p651_p2, %p650_p1 }
   0xc   :  { %p653_p4 = pnand %p652_p3, %p646_p0 }
   0xe   :  { %656 = shalt.err (!%p653_p4)
}
   0xf   :  { %40 = dma.hbm_to_vmem [thread:$0]  %s816_s2, 128, %s38_s12, [#allocation7]  }
  0x10   :  { %s665_s8 = scalar_lea.vmem %s28_s14, 32  ;;  %p670_p6 = scmp.lt.s32.totalorder %s28_s14, %s28_s14 }
  0x11   :  { %p666_p5 = scmp.ne.s32.totalorder %s28_s14, %s665_s8  ;;  %p671_p7 = scmp.lt.s32.totalorder %s665_s8, %s665_s8 }
  0x13   :  { %p672_p8 = por %p671_p7, %p670_p6 }
  0x15   :  { %p673_p9 = pnand %p672_p8, %p666_p5 }
  0x17   :  { %676 = shalt.err (!%p673_p9)
}
  0x18   :  { %30 = dma.hbm_to_vmem [thread:$0]  %s815_s1, 32, %s28_s14, [#allocation4]  }
  0x19   :  { %s725_s20 = smov [#allocation8]  }
  0x1a   :  { %s50_s21 = sshll.u32 %s725_s20, 4  ;;  %s51_s21 = int_to_ptr.vmem [resolvable:$true] %s50_s21 }
  0x1b   :  { %s685_s22 = scalar_lea.vmem %s51_s21, 4096  ;;  %p690_p11 = scmp.lt.s32.totalorder %s51_s21, %s51_s21 }
  0x1c   :  { %p686_p10 = scmp.ne.s32.totalorder %s51_s21, %s685_s22  ;;  %p691_p12 = scmp.lt.s32.totalorder %s685_s22, %s685_s22 }
  0x1e   :  { %p692_p13 = por %p691_p12, %p690_p11 }
  0x20   :  { %p693_p0 = pnand %p692_p13, %p686_p10 }
  0x22   :  { %696 = shalt.err (!%p693_p0)
}
  0x23   :  { %s726_s2 = smov 128   ;;  %s727_s23 = smov 8  }
  0x24   :  { %56 = dma.hbm_to_vmem [thread:$0]  %s819_s5, 4096, %s51_s21, [#allocation7], %s726_s2, %s726_s2, %s727_s23  }
  0x25   :  { %717 = dma.done.wait [#allocation4], 32  }
  0x26   :  { %718 = vsyncadd [#allocation4], 4294967264 }
  0x27   :  { %719 = dma.done.wait [#allocation7], 4224  }
  0x28   :  { %720 = vsyncadd [#allocation7], 4294963072  ;;  %v728_v1 = vmov 0   ;;  %vm92_vm0 = vcmask 1041408   ;;  %v75_v3 = vld [vmem:[#allocation3] sm:$0x3]  ;;  %v199_v45 = vlaneseq }
  0x29   :  { %131 = vmatprep.mubr.bf16.mxu1 %v728_v1  ;;  %v539_v2 = vld.sshfl [vmem:[%s817_s3] sm:$0x33 pattern:$0x76325410]  ;;  %vm149_vm1 = vcmask 1043456   ;;  %v76_v11 = vpack.c.bf16 %v75_v3, %v75_v3  ;;  %vm88_vm2 = vcmask 31744  }
  0x2a   :  { %v87_v4 = vcombine.high %v539_v2, %v539_v2  ;;  %v94_v5 = vsel %vm92_vm0, %v539_v2, 0  ;;  %v77_v6 = vld [vmem:[#allocation6] sm:$0xff]  ;;  %v592_v12 = vld [vmem:[#allocation8 + $0x64] ss:$8 sps:$4 sm:$0xff]   ;;  %v594_v14 = vld [vmem:[#allocation8 + $0x60] ss:$8 sps:$4 sm:$0xff]  }
  0x2b   :  { %v543_v7 = vcombine.high %v77_v6, %v77_v6  ;;  %v542_v8 = vcombine.low %v77_v6, %v77_v6  ;;  %v589_v9 = vld [vmem:[#allocation8 + $0x74] ss:$8 sps:$4 sm:$0xff]   ;;  %v591_v10 = vld [vmem:[#allocation8 + $0x70] ss:$8 sps:$4 sm:$0xff]   ;;  %v598_v18 = vld [vmem:[#allocation8 + $0x44] ss:$8 sps:$4 sm:$0xff]  }
  0x2c   :  { %540 = vmatprep.subr.msk.bf16.mxu1 %vm92_vm0, %v87_v4  ;;  %419 = vmatprep.subr.bf16.mxu0 %v589_v9  ;;  %v595_v15 = vld [vmem:[#allocation8 + $0x54] ss:$8 sps:$4 sm:$0xff]   ;;  %v597_v17 = vld [vmem:[#allocation8 + $0x50] ss:$8 sps:$4 sm:$0xff]   ;;  %vm145_vm3 = vcmask 64512   ;;  %v200_v46 = vshrl.u32 %v199_v45, 7 }
  0x2d   :  { %114 = vmatpush1.bf16.msra.mxu1 %v94_v5  ;;  %v151_v13 = vsel %vm149_vm1, %v542_v8, 0  ;;  %420 = vmatpush1.bf16.msra.mxu0 %v591_v10  ;;  %v73_v16 = vld [vmem:[%s814_s0] sm:$0x3]  ;;  %v600_v20 = vld [vmem:[#allocation8 + $0x40] ss:$8 sps:$4 sm:$0xff]   ;;  %vm521_vm4 = vcmask 8192  }
  0x2e   :  { %544 = vmatprep.subr.msk.bf16.mxu1 %vm149_vm1, %v543_v7  ;;  %421 = vmatprep.subr.bf16.mxu0 %v592_v12  ;;  %v74_v19 = vpack.c.bf16 %v73_v16, %v73_v16  ;;  %v601_v21 = vld [vmem:[#allocation8 + $0x34] ss:$8 sps:$4 sm:$0xff]   ;;  %v603_v22 = vld [vmem:[#allocation8 + $0x30] ss:$8 sps:$4 sm:$0xff]   ;;  %v604_v23 = vld [vmem:[#allocation8 + $0x24] ss:$8 sps:$4 sm:$0xff]  }
  0x2f   :  { %v606_v24 = vld [vmem:[#allocation8 + $0x20] ss:$8 sps:$4 sm:$0xff]   ;;  %v607_v25 = vld [vmem:[#allocation8 + $0x14] ss:$8 sps:$4 sm:$0xff]   ;;  %v609_v26 = vld [vmem:[#allocation8 + $0x10] ss:$8 sps:$4 sm:$0xff]  }
  0x30   :  { %541 = vmatmul.mubr.msk.bf16.vlgmr.msra.gmra.mxu1 %vm88_vm2, %v76_v11  ;;  %v610_v27 = vld [vmem:[#allocation8 + $0x4] ss:$8 sps:$4 sm:$0xff]   ;;  %v612_v28 = vld [vmem:[#allocation8] ss:$8 sps:$4 sm:$0xff]   ;;  %v613_v29 = vld [vmem:[#allocation8 + $0xf4] ss:$8 sps:$4 sm:$0xff]  }
  0x31   :  { %171 = vmatpush1.bf16.msra.mxu1 %v151_v13  ;;  %188 = vmatprep.mubr.bf16.mxu1 %v728_v1  ;;  %v615_v30 = vld [vmem:[#allocation8 + $0xf0] ss:$8 sps:$4 sm:$0xff]   ;;  %v616_v31 = vld [vmem:[#allocation8 + $0xe4] ss:$8 sps:$4 sm:$0xff]   ;;  %v618_v32 = vld [vmem:[#allocation8 + $0xe0] ss:$8 sps:$4 sm:$0xff]  }
  0x32   :  { %422 = vmatpush1.bf16.msra.mxu0 %v594_v14  ;;  %v619_v33 = vld [vmem:[#allocation8 + $0xd4] ss:$8 sps:$4 sm:$0xff]   ;;  %v621_v34 = vld [vmem:[#allocation8 + $0xd0] ss:$8 sps:$4 sm:$0xff]   ;;  %v622_v35 = vld [vmem:[#allocation8 + $0xc4] ss:$8 sps:$4 sm:$0xff]  }
  0x33   :  { %423 = vmatprep.subr.bf16.mxu0 %v595_v15  ;;  %v624_v36 = vld [vmem:[#allocation8 + $0xc0] ss:$8 sps:$4 sm:$0xff]   ;;  %v625_v37 = vld [vmem:[#allocation8 + $0xb4] ss:$8 sps:$4 sm:$0xff]   ;;  %v627_v38 = vld [vmem:[#allocation8 + $0xb0] ss:$8 sps:$4 sm:$0xff]  }
  0x34   :  { %v628_v39 = vld [vmem:[#allocation8 + $0xa4] ss:$8 sps:$4 sm:$0xff]   ;;  %v630_v40 = vld [vmem:[#allocation8 + $0xa0] ss:$8 sps:$4 sm:$0xff]   ;;  %v631_v41 = vld [vmem:[#allocation8 + $0x94] ss:$8 sps:$4 sm:$0xff]  }
  0x35   :  { %v633_v42 = vld [vmem:[#allocation8 + $0x90] ss:$8 sps:$4 sm:$0xff]   ;;  %v634_v43 = vld [vmem:[#allocation8 + $0x84] ss:$8 sps:$4 sm:$0xff]   ;;  %v636_v44 = vld [vmem:[#allocation8 + $0x80] ss:$8 sps:$4 sm:$0xff]  }
  0x36   :  { %424 = vmatpush1.bf16.msra.mxu0 %v597_v17  ;;  %v201_v49 = vsub.s32 0, %v200_v46  ;;  %v197_v51 = vld [vmem:[%s818_s4] sm:$0x3]  ;;  %v205_v52 = vsub.s32 1, %v200_v46 }
  0x37   :  { %425 = vmatprep.subr.bf16.mxu0 %v598_v18  ;;  %v247_v4 = vld [vmem:[%s820_s6] sm:$0x3]  ;;  %s729_s6 = smov [#allocation9]  }
  0x38   :  { %545 = vmatmul.mubr.msk.bf16.vlgmr.msra.gmra.mxu1 %vm145_vm3, %v74_v19  ;;  %v202_v54 = vrot.slane %v197_v51, %v201_v49  ;;  %v206_v57 = vrot.slane %v197_v51, %v205_v52  ;;  %v252_v5 = vrot.slane %v247_v4, %v201_v49  ;;  %v462_v6 = vld [vmem:[%s821_s7] sm:$0x3]  ;;  %v256_v7 = vrot.slane %v247_v4, %v205_v52  ;;  %s529_s7 = sshll.u32 %s729_s6, 4  ;;  %s530_s7 = int_to_ptr.vmem [resolvable:$true] %s529_s7 }
  0x39   :  { %v467_v10 = vrot.slane %v462_v6, %v201_v49  ;;  %v471_v14 = vrot.slane %v462_v6, %v205_v52  ;;  %s697_s10 = scalar_lea.vmem %s530_s7, 16  ;;  %s701_s11 = scalar_lea.vmem %s530_s7, 32 }
  0x3a   :  { %426 = vmatpush1.bf16.msra.mxu0 %v600_v20  ;;  %p698_p1 = scmp.ne.s32.totalorder %s530_s7, %s697_s10  ;;  %p702_p2 = scmp.lt.s32.totalorder %s530_s7, %s530_s7 }
  0x3b   :  { %427 = vmatprep.subr.bf16.mxu0 %v601_v21  ;;  %p703_p3 = scmp.lt.s32.totalorder %s701_s11, %s697_s10 }
  0x3d   :  { %p704_p4 = por %p703_p3, %p702_p2 }
  0x3e   :  { %428 = vmatpush1.bf16.msra.mxu0 %v603_v22 }
  0x3f   :  { %429 = vmatprep.subr.bf16.mxu0 %v604_v23  ;;  %v578_v23 = vld [vmem:[#allocation2] ss:$0 sm:$0xff]  ;;  %p705_p5 = pnand %p704_p4, %p698_p1 }
  0x42   :  { %430 = vmatpush1.bf16.msra.mxu0 %v606_v24 }
  0x43   :  { %431 = vmatprep.subr.bf16.mxu0 %v607_v25 }
  0x46   :  { %432 = vmatpush1.bf16.msra.mxu0 %v609_v26 }
  0x47   :  { %433 = vmatprep.subr.bf16.mxu0 %v610_v27 }
  0x4a   :  { %434 = vmatpush1.bf16.msra.mxu0 %v612_v28 }
  0x4b   :  { %435 = vmatprep.subr.bf16.mxu0 %v613_v29 }
  0x4e   :  { %436 = vmatpush2.bf16.msra.mxu0 %v615_v30 }
  0x4f   :  { %437 = vmatprep.subr.bf16.mxu0 %v616_v31 }
  0x52   :  { %438 = vmatpush2.bf16.msra.mxu0 %v618_v32 }
  0x53   :  { %439 = vmatprep.subr.bf16.mxu0 %v619_v33 }
  0x56   :  { %440 = vmatpush2.bf16.msra.mxu0 %v621_v34 }
  0x57   :  { %441 = vmatprep.subr.bf16.mxu0 %v622_v35 }
  0x5a   :  { %442 = vmatpush2.bf16.msra.mxu0 %v624_v36 }
  0x5b   :  { %443 = vmatprep.subr.bf16.mxu0 %v625_v37 }
  0x5e   :  { %444 = vmatpush2.bf16.msra.mxu0 %v627_v38 }
  0x5f   :  { %445 = vmatprep.subr.bf16.mxu0 %v628_v39 }
  0x62   :  { %446 = vmatpush2.bf16.msra.mxu0 %v630_v40 }
  0x63   :  { %447 = vmatprep.subr.bf16.mxu0 %v631_v41 }
  0x66   :  { %448 = vmatpush2.bf16.msra.mxu0 %v633_v42 }
  0x67   :  { %449 = vmatprep.subr.bf16.mxu0 %v634_v43 }
  0x6a   :  { %450 = vmatpush2.bf16.msra.mxu0 %v636_v44 }
  0xf0   :  { %v133_v47 = vpop.f32.mrf.mxu1 }
  0xf2   :  { %v135_v48 = vpop.f32.mrf.mxu1 }
  0xf4   :  { %v137_v50 = vpop.f32.mrf.mxu1 }
  0xf6   :  { %v138_v53 = vpop.f32.mrf.mxu1 }
  0xf8   :  { %v190_v55 = vpop.f32.mrf.mxu1 }
  0xf9   :  { %v191_v56 = vadd.f32 %v190_v55, %v133_v47 }
  0xfa   :  { %v192_v58 = vpop.f32.mrf.mxu1 }
  0xfb   :  { %v209_v59 = vadd.f32 %v202_v54, %v191_v56  ;;  %v193_v60 = vadd.f32 %v192_v58, %v135_v48 }
  0xfc   :  { %v194_v61 = vpop.f32.mrf.mxu1 }
  0xfd   :  { %v210_v62 = vadd.f32 %v206_v57, %v193_v60  ;;  %v211_v63 = vmax.f32 %v209_v59, 0.0 }
  0xfe   :  { %v195_v0 = vpop.f32.mrf.mxu1 }
  0xff   :  { %v212_v1 = vmax.f32 %v210_v62, 0.0  ;;  %v213_v3 = vpack.c.bf16 %v211_v63, %v211_v63 }
 0x101   :  { %v214_v2 = vpack.c.bf16 %v212_v1, %v212_v1 }
 0x103   :  { %451 = vmatprep.mubr.bf16.mxu0 %v214_v2 }
 0x104   :  { %452 = vmatmul.mubr.bf16.vlgmr.msra.gmra.mxu0 %v213_v3 }
 0x1c4   :  { %v453_v8 = vpop.f32.mrf.mxu0 }
 0x1c5   :  { %v454_v9 = vadd.f32 %v453_v8, %v252_v5 }
 0x1c6   :  { %v455_v11 = vpop.f32.mrf.mxu0 }
 0x1c7   :  { %v460_v12 = vmax.f32 %v454_v9, 0.0  ;;  %v456_v13 = vadd.f32 %v455_v11, %v256_v7 }
 0x1c8   :  { %v457_v15 = vpop.f32.mrf.mxu0 }
 0x1c9   :  { %v461_v16 = vmax.f32 %v456_v13, 0.0  ;;  %v474_v17 = vmul.f32 %v467_v10, %v460_v12 }
 0x1ca   :  { %v458_v18 = vpop.f32.mrf.mxu0 }
 0x1cb   :  { %v475_v19 = vmul.f32 %v471_v14, %v461_v16  ;;  %v476_v20 = vsel %vm92_vm0, %v474_v17, 0.0 }
 0x1cd   :  { %v477_v21 = vsel %vm92_vm0, %v475_v19, 0.0 }
 0x1ce   :  { %v478_v22 = vadd.f32 %v477_v21, %v476_v20 }
 0x1d0   :  { %479 = vadd.xlane.f32.xlu0 %v478_v22 }
 0x259   :  { %v480_v24 = vpop.xlane.xlu0 %479 }
 0x25a   :  { %v488_v25 = vadd.f32 %v578_v23, %v480_v24 }
 0x25c   :  { %489 = vxpose.xlu0.b32.start.end [1/1] (short) (narrow) %v488_v25, 8 }
 0x2d8   :  { %v505_v26 = vpop.trf.xlu0 }
 0x2d9   :  { %522 = vst.msk [vmem:[#allocation9] sm:$0x1] %vm521_vm4, %v505_v26 }
 0x2da   :  { %708 = shalt.err (!%p705_p5)
}
 0x2db   :  { %532 = dma.vmem_to_hbm [thread:$0]  %s530_s7, 16, %s823_s9, [#allocation5]  }
 0x2dc   :  { %721 = dma.done.wait [#allocation5], 16  }
 0x2dd   :  { %722 = vsyncadd [#allocation5], 4294967280 }
 0x2de   :  { %536 = vsyncpa [#allocation4], 1 }
 0x2df   :  { %537 = vsyncpa [#allocation7], 1 }
 0x2e0   :  { %538 = vsyncpa [#allocation5], 1 }

</bundles_post_ra>
